<compile_context>
chip_gen: v7x
topology: tpu7x:2x2x1
jax: 0.10.0
libtpu: 0.0.40
codegen_flags: <defaults>
</compile_context>

<pallas_src>
import math

import jax
import jax.numpy as jnp
from jax.experimental import pallas as pl
from jax.experimental.pallas import tpu as pltpu


def _bce_kernel(x_ref, y_ref, o_ref):
    """Stable BCE-with-logits on one (block_rows, lanes) tile."""
    x = x_ref[...].astype(jnp.float32)   # cast in-kernel; HBM stays native dtype
    y = y_ref[...].astype(jnp.float32)
    z = jnp.exp(-jnp.abs(x))             # EUP slot (free while DMA-bound)
    # log1p(z) without relying on a log1p lowering: 2-term series for tiny z.
    softplus = jnp.where(z > 1e-4, jnp.log(1.0 + z), z * (1.0 - 0.5 * z))
    loss = jnp.maximum(x, 0.0) - x * y + softplus
    o_ref[...] = loss.astype(o_ref.dtype)


def binary_cross_entropy_with_logits(logits, global_features, labels, *,
                                     max_lanes=512,
                                     target_block_elems=512 * 1024):
    """Elementwise BCE-with-logits, reduction='none'. Matches the PyTorch module.

    target_block_elems=512K -> 1024x512 rows/lanes at f32 (~12 MiB working set,
    fits every generation's default scoped VMEM).  On v7x, target_block_elems
    can be doubled together with CompilerParams(vmem_limit_bytes=32<<20).
    """
    del global_features  # unused by the PyTorch module as well
    assert logits.shape == labels.shape, (logits.shape, labels.shape)
    orig_shape = logits.shape
    out_dtype = logits.dtype
    total = int(math.prod(orig_shape)) if orig_shape else 1
    if total == 0:
        return jnp.zeros(orig_shape, out_dtype)

    # Lane width: largest multiple of 128 (<= max_lanes) dividing `total`, so
    # the common case needs no padding at all; worst case pad < 128 elements.
    lanes = max_lanes
    while lanes > 128 and total % lanes != 0:
        lanes //= 2
    pad = (-total) % lanes

    x = logits.reshape(-1)
    y = labels.reshape(-1)
    if pad:
        x = jnp.pad(x, (0, pad))
        y = jnp.pad(y, (0, pad))
    rows = (total + pad) // lanes
    x = x.reshape(rows, lanes)
    y = y.reshape(rows, lanes)

    # Row tile: large (amortizes the ~0.35us/step overhead), multiple of 8
    # unless it covers the whole (small) array.  Partial final block is fine.
    block_rows = min(max(target_block_elems // lanes, 8), rows)
    if block_rows < rows and block_rows % 8:
        block_rows = max(8, (block_rows // 8) * 8)
    grid = (pl.cdiv(rows, block_rows),)

    in_bytes = total * (jnp.dtype(logits.dtype).itemsize
                        + jnp.dtype(labels.dtype).itemsize)
    out_bytes = total * jnp.dtype(out_dtype).itemsize

    out = pl.pallas_call(
        _bce_kernel,
        out_shape=jax.ShapeDtypeStruct((rows, lanes), out_dtype),
        grid_spec=pltpu.PrefetchScalarGridSpec(
            num_scalar_prefetch=0,
            grid=grid,
            in_specs=[
                pl.BlockSpec((block_rows, lanes), lambda i: (i, 0)),
                pl.BlockSpec((block_rows, lanes), lambda i: (i, 0)),
            ],
            out_specs=pl.BlockSpec((block_rows, lanes), lambda i: (i, 0)),
        ),
        compiler_params=pltpu.CompilerParams(
            dimension_semantics=("parallel",)),
        cost_estimate=pl.CostEstimate(
            flops=8 * total,
            transcendentals=2 * total,
            bytes_accessed=in_bytes + out_bytes),
    )(x, y)

    out = out.reshape(-1)
    if pad:
        out = out[:total]
    return out.reshape(orig_shape)


def _reference(logits, labels):
    """Pure-JAX reference of the same stable formula (PyTorch-equivalent)."""
    x = logits.astype(jnp.float32)
    y = labels.astype(jnp.float32)
    loss = jnp.maximum(x, 0.0) - x * y + jnp.log1p(jnp.exp(-jnp.abs(x)))
    return loss.astype(logits.dtype)


if __name__ == "__main__":
    key = jax.random.PRNGKey(0)
    k1, k2, k3 = jax.random.split(key, 3)

    # Shapes consistent with the module: per-pixel mask logits/labels, plus an
    # (unused) global-feature tensor that the forward signature takes.
    N, C, H, W = 2, 4, 16, 16
    logits = 3.0 * jax.random.normal(k1, (N, C, H, W), dtype=jnp.float32)
    labels = (jax.random.uniform(k2, (N, C, H, W)) > 0.5).astype(jnp.float32)
    global_features = jax.random.normal(k3, (N, 32), dtype=jnp.float32)  # unused

    fwd = jax.jit(binary_cross_entropy_with_logits)
    out = jax.block_until_ready(fwd(logits, global_features, labels))
    ref = _reference(logits, labels)
    assert out.shape == logits.shape and out.dtype == logits.dtype
    assert jnp.allclose(out, ref, atol=1e-5, rtol=1e-5), \
        float(jnp.max(jnp.abs(out - ref)))

    # Ragged size (28x28 mask-head resolution): exercises the small-pad path
    # and a multi-step grid with a partial final row block.
    l2 = 4.0 * jax.random.normal(k1, (2, 4, 28, 28), dtype=jnp.float32)
    t2 = (jax.random.uniform(k2, (2, 4, 28, 28)) > 0.5).astype(jnp.float32)
    out2 = jax.block_until_ready(
        jax.jit(lambda a, g, b: binary_cross_entropy_with_logits(
            a, g, b, target_block_elems=1024))(l2, global_features, t2))
    assert jnp.allclose(out2, _reference(l2, t2), atol=1e-5, rtol=1e-5)

    # bf16 inputs stay bf16 through HBM; f32 math happens inside the kernel.
    l3 = logits.astype(jnp.bfloat16)
    t3 = labels.astype(jnp.bfloat16)
    out3 = jax.block_until_ready(fwd(l3, global_features, t3))
    assert out3.dtype == jnp.bfloat16
    assert jnp.allclose(out3.astype(jnp.float32),
                        _reference(l3, t3).astype(jnp.float32),
                        atol=2e-2, rtol=2e-2)

    print("KERNEL_OK")
</pallas_src>

<mosaic_0001>
module attributes {stable_mosaic.version = 11 : i64} {
  func.func @_bce_kernel(%arg0: i32, %arg1: memref<4x512xf32, #tpu.memory_space<vmem>>, %arg2: memref<4x512xf32, #tpu.memory_space<vmem>>, %arg3: memref<4x512xf32, #tpu.memory_space<vmem>>) attributes {dimension_semantics = [#tpu.dimension_semantics<parallel>], iteration_bounds = array<i64: 1>, scalar_prefetch = 0 : i64, scratch_operands = 0 : i64, tpu.core_type = #tpu.core_type<tc>, window_params = [{transform_indices = @transform_0, window_bounds = array<i64: 4, 512>}, {transform_indices = @transform_1, window_bounds = array<i64: 4, 512>}, {transform_indices = @transform_2, window_bounds = array<i64: 4, 512>}]} {
    %c0 = arith.constant 0 : index
    %c0_0 = arith.constant 0 : index
    %0 = vector.load %arg1[%c0, %c0_0] : memref<4x512xf32, #tpu.memory_space<vmem>>, vector<4x512xf32>
    %c0_1 = arith.constant 0 : index
    %c0_2 = arith.constant 0 : index
    %1 = vector.load %arg2[%c0_1, %c0_2] : memref<4x512xf32, #tpu.memory_space<vmem>>, vector<4x512xf32>
    %2 = math.absf %0 : vector<4x512xf32>
    %cst = arith.constant 0.000000e+00 : f32
    %3 = vector.broadcast %cst : f32 to vector<4x512xf32>
    %4 = arith.subf %3, %2 : vector<4x512xf32>
    %5 = math.exp %4 : vector<4x512xf32>
    %cst_3 = arith.constant 9.99999974E-5 : f32
    %6 = vector.broadcast %cst_3 : f32 to vector<4x512xf32>
    %7 = arith.cmpf ogt, %5, %6 : vector<4x512xf32>
    %cst_4 = arith.constant 1.000000e+00 : f32
    %8 = vector.broadcast %cst_4 : f32 to vector<4x512xf32>
    %9 = arith.addf %8, %5 : vector<4x512xf32>
    %10 = math.log %9 : vector<4x512xf32>
    %cst_5 = arith.constant 5.000000e-01 : f32
    %11 = vector.broadcast %cst_5 : f32 to vector<4x512xf32>
    %12 = arith.mulf %11, %5 : vector<4x512xf32>
    %cst_6 = arith.constant 1.000000e+00 : f32
    %13 = vector.broadcast %cst_6 : f32 to vector<4x512xf32>
    %14 = arith.subf %13, %12 : vector<4x512xf32>
    %15 = arith.mulf %5, %14 : vector<4x512xf32>
    %16 = arith.select %7, %10, %15 : vector<4x512xi1>, vector<4x512xf32>
    %cst_7 = arith.constant 0.000000e+00 : f32
    %17 = vector.broadcast %cst_7 : f32 to vector<4x512xf32>
    %18 = arith.maximumf %0, %17 : vector<4x512xf32>
    %19 = arith.mulf %0, %1 : vector<4x512xf32>
    %20 = arith.subf %18, %19 : vector<4x512xf32>
    %21 = arith.addf %20, %16 : vector<4x512xf32>
    %c0_8 = arith.constant 0 : index
    %c0_9 = arith.constant 0 : index
    %22 = vector.load %arg3[%c0_8, %c0_9] : memref<4x512xf32, #tpu.memory_space<vmem>>, vector<4x512xf32>
    tpu.vector_store %arg3[%c0_8, %c0_9], %21 {strides = array<i32>} : memref<4x512xf32, #tpu.memory_space<vmem>>, vector<4x512xf32>,
    return
  }
  func.func @transform_0(%arg0: i32) -> (i32, i32) {
    %c0_i32 = arith.constant 0 : i32
    %c0_i32_0 = arith.constant 0 : i32
    return %arg0, %c0_i32 : i32, i32
  }
  func.func @transform_1(%arg0: i32) -> (i32, i32) {
    %c0_i32 = arith.constant 0 : i32
    %c0_i32_0 = arith.constant 0 : i32
    return %arg0, %c0_i32 : i32, i32
  }
  func.func @transform_2(%arg0: i32) -> (i32, i32) {
    %c0_i32 = arith.constant 0 : i32
    %c0_i32_0 = arith.constant 0 : i32
    return %arg0, %c0_i32 : i32, i32
  }
}

</mosaic_0001>

<bundles_post_ra>
// kernel: binary_cross_entropy_with_logits.1
= control target key start
LH: loop header
LB: loop body
LE: loop exit
PB: predicated region body
PF: predicated region fallthrough
CT: control target
= control target key end

     0   :  { %s94_s0 = inlined_call_operand.vmem [shape: f32[4,512], index: 0, kind: input, shape index: {}]   ;;  %s95_s1 = inlined_call_operand.vmem [shape: f32[4,512], index: 1, kind: input, shape index: {}]   ;;  %s96_s2 = inlined_call_operand.vmem [shape: f32[4,512], index: 2, kind: output, shape index: {}]  }
   0x1   :  { %v11_v0 = vld [vmem:[%s94_s0] sm:$0xff]  ;;  %v12_v1 = vld [vmem:[%s94_s0 + $0x8] sm:$0xff] }
   0x2   :  { %v15_v2 = vand.u32 2147483647, %v11_v0  ;;  %v16_v3 = vand.u32 2147483647, %v12_v1  ;;  %v13_v14 = vld [vmem:[%s95_s1] sm:$0xff]  ;;  %v14_v15 = vld [vmem:[%s95_s1 + $0x8] sm:$0xff] }
   0x3   :  { %v39_v17 = vmax.f32 %v11_v0, 0.0  ;;  %v41_v18 = vmul.f32 %v13_v14, %v11_v0  ;;  %v40_v20 = vmax.f32 %v12_v1, 0.0  ;;  %v42_v21 = vmul.f32 %v14_v15, %v12_v1 }
   0x4   :  { %v17_v4 = vsub.f32 0.0, %v15_v2  ;;  %v18_v5 = vsub.f32 0.0, %v16_v3 }
   0x5   :  { %v43_v24 = vsub.f32 %v39_v17, %v41_v18  ;;  %v44_v28 = vsub.f32 %v40_v20, %v42_v21 }
   0x6   :  { %v19_v6 = vmul.f32 1.442695, %v17_v4  ;;  %v21_v7 = vmul.f32 1.442695, %v18_v5 }
   0x8   :  { %53 = vpow2.f32 %v19_v6 }
   0x9   :  { %55 = vpow2.f32 %v21_v7 }
  0x12   :  { %v54_v8 = vpop.eup %53 }
  0x13   :  { %v56_v9 = vpop.eup %55  ;;  %v25_v10 = vadd.f32 1.0, %v54_v8  ;;  %v31_v12 = vmul.f32 0.5, %v54_v8  ;;  %vm23_vm0 = vcmp.gt.f32.partialorder %v54_v8, 0.0001 }
  0x14   :  { %v26_v11 = vadd.f32 1.0, %v56_v9  ;;  %v32_v13 = vmul.f32 0.5, %v56_v9  ;;  %vm24_vm1 = vcmp.gt.f32.partialorder %v56_v9, 0.0001 }
  0x15   :  { %57 = vlog2.f32 %v25_v10  ;;  %v33_v16 = vsub.f32 1.0, %v31_v12 }
  0x16   :  { %59 = vlog2.f32 %v26_v11  ;;  %v34_v19 = vsub.f32 1.0, %v32_v13 }
  0x17   :  { %v35_v22 = vmul.f32 %v54_v8, %v33_v16 }
  0x18   :  { %v36_v25 = vmul.f32 %v56_v9, %v34_v19 }
  0x1f   :  { %v58_v23 = vpop.eup %57 }
  0x20   :  { %v60_v26 = vpop.eup %59  ;;  %v28_v27 = vmul.f32 0.6931472, %v58_v23 }
  0x21   :  { %v30_v29 = vmul.f32 0.6931472, %v60_v26 }
  0x22   :  { %v37_v30 = vsel %vm23_vm0, %v28_v27, %v35_v22 }
  0x23   :  { %v45_v31 = vadd.f32 %v43_v24, %v37_v30  ;;  %v38_v32 = vsel %vm24_vm1, %v30_v29, %v36_v25 }
  0x24   :  { %v46_v33 = vadd.f32 %v44_v28, %v38_v32 }
  0x25   :  { %47 = vst [vmem:[%s96_s2] sm:$0xff] %v45_v31 }
  0x26   :  { %48 = vst [vmem:[%s96_s2 + $0x8] sm:$0xff] %v46_v33 }

</bundles_post_ra>
